<compile_context>
chip_gen: v7x
topology: tpu7x:2x2x1
jax: 0.10.0
libtpu: 0.0.40
codegen_flags: <defaults>
</compile_context>

<pallas_src>
import jax
import jax.numpy as jnp
from jax.experimental import pallas as pl
from jax.experimental.pallas import tpu as pltpu

HIDDEN = 256


def _critic_kernel(s_ref, a_ref, o_ref,
                   w1s_ref, w1a_ref, w1o_ref, b14_ref,
                   w25_ref, b25_ref,
                   w36_ref, b36_ref,
                   q12_ref):
    # Layer 1, both heads fused along the output axis.  The torch concat of
    # [state, action, option] is realized as three partial contractions
    # against row-splits of the fused weight (no concat, no feature padding).
    hg = jnp.dot(s_ref[...], w1s_ref[...], preferred_element_type=jnp.float32)
    hg = hg + jnp.dot(a_ref[...], w1a_ref[...],
                      preferred_element_type=jnp.float32)
    hg = hg + jnp.dot(o_ref[...], w1o_ref[...],
                      preferred_element_type=jnp.float32)
    hg = jnp.maximum(hg + b14_ref[...], 0.0)                   # [bm, 512] f32

    # Layer 2: block-diagonal blockdiag(w2, w5) -> one [512, 512] matmul.
    h2 = jnp.dot(hg.astype(jnp.bfloat16), w25_ref[...],
                 preferred_element_type=jnp.float32)
    h2 = jnp.maximum(h2 + b25_ref[...], 0.0)                   # [bm, 512] f32

    # Layer 3: stacked [512, 2] projection -> col 0 = q1, col 1 = q2.
    q12 = jnp.dot(h2.astype(jnp.bfloat16), w36_ref[...],
                  preferred_element_type=jnp.float32)
    q12_ref[...] = q12 + b36_ref[...]


def critic_forward(state, action, option, params, *, block_m=256):
    """Returns (q1, q2), each of shape [batch, 1], matching Critic.forward."""
    B = state.shape[0]

    # bf16 activations halve input DMA bytes and feed the MXU natively.
    s = state.astype(jnp.bfloat16)
    a = action.astype(jnp.bfloat16)
    o = option.astype(jnp.bfloat16)

    # Batch tiling: B <= block_m -> one tile whose block shape equals the full
    # array (legal for any B, no padding).  Larger batches tile at block_m
    # (multiple of 16, bf16-friendly) with Pallas handling a ragged tail.
    bm = B if B <= block_m else block_m
    grid = (pl.cdiv(B, bm),)

    def w_spec(arr):
        # Constant block index => DMA'd once, VMEM-resident across batch tiles.
        return pl.BlockSpec(arr.shape, lambda i: (0, 0))

    in_dim = (params["w14_s"].shape[0] + params["w14_a"].shape[0]
              + params["w14_o"].shape[0])
    wide = params["w25"].shape[0]                               # 2 * hidden
    param_bytes = sum(int(p.size) * p.dtype.itemsize for p in params.values())
    cost = pl.CostEstimate(
        flops=2 * B * (in_dim * wide + wide * wide + wide * 2),
        transcendentals=0,
        bytes_accessed=int(B * in_dim * 2 + B * 2 * 4 + param_bytes))

    q12 = pl.pallas_call(
        _critic_kernel,
        grid=grid,
        in_specs=[
            pl.BlockSpec((bm, s.shape[1]), lambda i: (i, 0)),
            pl.BlockSpec((bm, a.shape[1]), lambda i: (i, 0)),
            pl.BlockSpec((bm, o.shape[1]), lambda i: (i, 0)),
            w_spec(params["w14_s"]), w_spec(params["w14_a"]),
            w_spec(params["w14_o"]), w_spec(params["b14"]),
            w_spec(params["w25"]), w_spec(params["b25"]),
            w_spec(params["w36"]), w_spec(params["b36"]),
        ],
        out_specs=pl.BlockSpec((bm, 2), lambda i: (i, 0)),
        out_shape=jax.ShapeDtypeStruct((B, 2), jnp.float32),
        compiler_params=pltpu.CompilerParams(
            dimension_semantics=("parallel",)),
        cost_estimate=cost,
    )(s, a, o,
      params["w14_s"], params["w14_a"], params["w14_o"], params["b14"],
      params["w25"], params["b25"],
      params["w36"], params["b36"])

    # Lane-packed [B, 2] -> the module's (q1, q2) signature.
    return q12[:, 0:1], q12[:, 1:2]


def init_critic_params(key, state_dim, action_dim, option_dim, hidden=256):
    """Deterministic init mimicking nn.Linear defaults (U(+-1/sqrt(fan_in))).

    Returns (kernel_params, ref_params):
      kernel_params: fused bf16 weights + f32 biases used by the kernel.
      ref_params:    plain f32 per-layer weights for the reference checks.
    """
    in_dim = state_dim + action_dim + option_dim

    def linear(k, fan_in, fan_out):
        kw, kb = jax.random.split(k)
        bound = 1.0 / jnp.sqrt(jnp.float32(fan_in))
        w = jax.random.uniform(kw, (fan_in, fan_out), jnp.float32, -bound, bound)
        b = jax.random.uniform(kb, (1, fan_out), jnp.float32, -bound, bound)
        return w, b

    ks = jax.random.split(key, 6)
    w1, b1 = linear(ks[0], in_dim, hidden)
    w2, b2 = linear(ks[1], hidden, hidden)
    w3, b3 = linear(ks[2], hidden, 1)
    w4, b4 = linear(ks[3], in_dim, hidden)
    w5, b5 = linear(ks[4], hidden, hidden)
    w6, b6 = linear(ks[5], hidden, 1)

    # Layer 1 fused along the output axis, then split along the input rows so
    # the kernel can consume state/action/option without a concat.
    w14 = jnp.concatenate([w1, w4], axis=1)                     # [in_dim, 512]
    w14_s = w14[:state_dim]
    w14_a = w14[state_dim:state_dim + action_dim]
    w14_o = w14[state_dim + action_dim:]
    b14 = jnp.concatenate([b1, b4], axis=1)                     # [1, 512]

    # Layer 2: block-diagonal blockdiag(w2, w5).
    w25 = jnp.zeros((2 * hidden, 2 * hidden), jnp.float32)
    w25 = w25.at[:hidden, :hidden].set(w2).at[hidden:, hidden:].set(w5)
    b25 = jnp.concatenate([b2, b5], axis=1)                     # [1, 512]

    # Layer 3: stacked [512, 2]; col 0 <- w3 (head 1), col 1 <- w6 (head 2).
    w36 = jnp.zeros((2 * hidden, 2), jnp.float32)
    w36 = w36.at[:hidden, 0:1].set(w3).at[hidden:, 1:2].set(w6)
    b36 = jnp.concatenate([b3, b6], axis=1)                     # [1, 2]

    kernel_params = dict(
        w14_s=w14_s.astype(jnp.bfloat16),
        w14_a=w14_a.astype(jnp.bfloat16),
        w14_o=w14_o.astype(jnp.bfloat16),
        b14=b14,
        w25=w25.astype(jnp.bfloat16), b25=b25,
        w36=w36.astype(jnp.bfloat16), b36=b36,
    )
    ref_params = dict(w1=w1, b1=b1, w2=w2, b2=b2, w3=w3, b3=b3,
                      w4=w4, b4=b4, w5=w5, b5=b5, w6=w6, b6=b6)
    return kernel_params, ref_params


def _reference_forward(state, action, option, rp, *, cast_bf16):
    """Pure-JAX unfused reference. cast_bf16=True mirrors the kernel's casts;
    cast_bf16=False is the exact f32 semantics of the PyTorch module."""
    sao = jnp.concatenate([state, action, option], axis=1)

    def lin(x, w, b):
        if cast_bf16:
            x = x.astype(jnp.bfloat16)
            w = w.astype(jnp.bfloat16)
        return jnp.dot(x, w, preferred_element_type=jnp.float32) + b

    h = jax.nn.relu(lin(sao, rp["w1"], rp["b1"]))
    h = jax.nn.relu(lin(h, rp["w2"], rp["b2"]))
    q1 = lin(h, rp["w3"], rp["b3"])
    g = jax.nn.relu(lin(sao, rp["w4"], rp["b4"]))
    g = jax.nn.relu(lin(g, rp["w5"], rp["b5"]))
    q2 = lin(g, rp["w6"], rp["b6"])
    return q1, q2


if __name__ == "__main__":
    # Small shapes consistent with the module's forward signature.
    batch, state_dim, action_dim, option_dim = 8, 17, 6, 4

    key = jax.random.PRNGKey(0)
    k_params, k_s, k_a, k_o = jax.random.split(key, 4)

    kernel_params, ref_params = init_critic_params(
        k_params, state_dim, action_dim, option_dim)

    state = jax.random.normal(k_s, (batch, state_dim), jnp.float32)
    action = jax.random.normal(k_a, (batch, action_dim), jnp.float32)
    option = jax.random.normal(k_o, (batch, option_dim), jnp.float32)

    fwd = jax.jit(critic_forward)
    q1, q2 = fwd(state, action, option, kernel_params)
    jax.block_until_ready((q1, q2))
    assert q1.shape == (batch, 1) and q2.shape == (batch, 1)

    # Check 1: vs. a reference applying the same bf16 weight/activation casts
    # (validates the fused layer-1 split, block-diagonal packing, tiling).
    r1, r2 = _reference_forward(state, action, option, ref_params,
                                cast_bf16=True)
    assert jnp.allclose(q1, r1, atol=2e-3, rtol=2e-3), \
        float(jnp.max(jnp.abs(q1 - r1)))
    assert jnp.allclose(q2, r2, atol=2e-3, rtol=2e-3), \
        float(jnp.max(jnp.abs(q2 - r2)))

    # Check 2: vs. the exact f32 module semantics, bounding the bf16 weight
    # quantization drift flagged in review (stays well inside this budget).
    f1, f2 = _reference_forward(state, action, option, ref_params,
                                cast_bf16=False)
    assert jnp.allclose(q1, f1, atol=5e-2, rtol=5e-2), \
        float(jnp.max(jnp.abs(q1 - f1)))
    assert jnp.allclose(q2, f2, atol=5e-2, rtol=5e-2), \
        float(jnp.max(jnp.abs(q2 - f2)))

    print("KERNEL_OK")
</pallas_src>

<mosaic_0001>
module attributes {stable_mosaic.version = 11 : i64} {
  func.func @_critic_kernel(%arg0: i32, %arg1: memref<8x17xbf16, #tpu.memory_space<vmem>>, %arg2: memref<8x6xbf16, #tpu.memory_space<vmem>>, %arg3: memref<8x4xbf16, #tpu.memory_space<vmem>>, %arg4: memref<17x512xbf16, #tpu.memory_space<vmem>>, %arg5: memref<6x512xbf16, #tpu.memory_space<vmem>>, %arg6: memref<4x512xbf16, #tpu.memory_space<vmem>>, %arg7: memref<1x512xf32, #tpu.memory_space<vmem>>, %arg8: memref<512x512xbf16, #tpu.memory_space<vmem>>, %arg9: memref<1x512xf32, #tpu.memory_space<vmem>>, %arg10: memref<512x2xbf16, #tpu.memory_space<vmem>>, %arg11: memref<1x2xf32, #tpu.memory_space<vmem>>, %arg12: memref<8x2xf32, #tpu.memory_space<vmem>>) attributes {dimension_semantics = [#tpu.dimension_semantics<parallel>], iteration_bounds = array<i64: 1>, scalar_prefetch = 0 : i64, scratch_operands = 0 : i64, tpu.core_type = #tpu.core_type<tc>, window_params = [{transform_indices = @transform_0, window_bounds = array<i64: 8, 17>}, {transform_indices = @transform_1, window_bounds = array<i64: 8, 6>}, {transform_indices = @transform_2, window_bounds = array<i64: 8, 4>}, {pipeline_mode = #tpu.pipeline_mode<synchronous>, transform_indices = @transform_3, window_bounds = array<i64: 17, 512>}, {pipeline_mode = #tpu.pipeline_mode<synchronous>, transform_indices = @transform_4, window_bounds = array<i64: 6, 512>}, {pipeline_mode = #tpu.pipeline_mode<synchronous>, transform_indices = @transform_5, window_bounds = array<i64: 4, 512>}, {pipeline_mode = #tpu.pipeline_mode<synchronous>, transform_indices = @transform_6, window_bounds = array<i64: 1, 512>}, {pipeline_mode = #tpu.pipeline_mode<synchronous>, transform_indices = @transform_7, window_bounds = array<i64: 512, 512>}, {pipeline_mode = #tpu.pipeline_mode<synchronous>, transform_indices = @transform_8, window_bounds = array<i64: 1, 512>}, {pipeline_mode = #tpu.pipeline_mode<synchronous>, transform_indices = @transform_9, window_bounds = array<i64: 512, 2>}, {pipeline_mode = #tpu.pipeline_mode<synchronous>, transform_indices = @transform_10, window_bounds = array<i64: 1, 2>}, {transform_indices = @transform_11, window_bounds = array<i64: 8, 2>}]} {
    %c0 = arith.constant 0 : index
    %c0_0 = arith.constant 0 : index
    %0 = vector.load %arg1[%c0, %c0_0] : memref<8x17xbf16, #tpu.memory_space<vmem>>, vector<8x17xbf16>
    %c0_1 = arith.constant 0 : index
    %c0_2 = arith.constant 0 : index
    %1 = vector.load %arg4[%c0_1, %c0_2] : memref<17x512xbf16, #tpu.memory_space<vmem>>, vector<17x512xbf16>
    %cst = arith.constant dense<0.000000e+00> : vector<8x512xf32>
    %2 = tpu.matmul %0, %1, %cst {dimension_numbers = #tpu.dot_dimension_numbers<[1], [0], [0], [1], [0, 0, 1, 1], [], []>} : vector<8x17xbf16>, vector<17x512xbf16>, vector<8x512xf32> -> vector<8x512xf32>
    %c0_3 = arith.constant 0 : index
    %c0_4 = arith.constant 0 : index
    %3 = vector.load %arg2[%c0_3, %c0_4] : memref<8x6xbf16, #tpu.memory_space<vmem>>, vector<8x6xbf16>
    %c0_5 = arith.constant 0 : index
    %c0_6 = arith.constant 0 : index
    %4 = vector.load %arg5[%c0_5, %c0_6] : memref<6x512xbf16, #tpu.memory_space<vmem>>, vector<6x512xbf16>
    %cst_7 = arith.constant dense<0.000000e+00> : vector<8x512xf32>
    %5 = tpu.matmul %3, %4, %cst_7 {dimension_numbers = #tpu.dot_dimension_numbers<[1], [0], [0], [1], [0, 0, 1, 1], [], []>} : vector<8x6xbf16>, vector<6x512xbf16>, vector<8x512xf32> -> vector<8x512xf32>
    %6 = arith.addf %2, %5 : vector<8x512xf32>
    %c0_8 = arith.constant 0 : index
    %c0_9 = arith.constant 0 : index
    %7 = vector.load %arg3[%c0_8, %c0_9] : memref<8x4xbf16, #tpu.memory_space<vmem>>, vector<8x4xbf16>
    %c0_10 = arith.constant 0 : index
    %c0_11 = arith.constant 0 : index
    %8 = vector.load %arg6[%c0_10, %c0_11] : memref<4x512xbf16, #tpu.memory_space<vmem>>, vector<4x512xbf16>
    %cst_12 = arith.constant dense<0.000000e+00> : vector<8x512xf32>
    %9 = tpu.matmul %7, %8, %cst_12 {dimension_numbers = #tpu.dot_dimension_numbers<[1], [0], [0], [1], [0, 0, 1, 1], [], []>} : vector<8x4xbf16>, vector<4x512xbf16>, vector<8x512xf32> -> vector<8x512xf32>
    %10 = arith.addf %6, %9 : vector<8x512xf32>
    %c0_13 = arith.constant 0 : index
    %c0_14 = arith.constant 0 : index
    %11 = vector.load %arg7[%c0_13, %c0_14] : memref<1x512xf32, #tpu.memory_space<vmem>>, vector<1x512xf32>
    %12 = vector.broadcast %11 : vector<1x512xf32> to vector<8x512xf32>
    %13 = arith.addf %10, %12 : vector<8x512xf32>
    %cst_15 = arith.constant 0.000000e+00 : f32
    %14 = vector.broadcast %cst_15 : f32 to vector<8x512xf32>
    %15 = arith.maximumf %13, %14 : vector<8x512xf32>
    %16 = arith.truncf %15 : vector<8x512xf32> to vector<8x512xbf16>
    %c0_16 = arith.constant 0 : index
    %c0_17 = arith.constant 0 : index
    %17 = vector.load %arg8[%c0_16, %c0_17] : memref<512x512xbf16, #tpu.memory_space<vmem>>, vector<512x512xbf16>
    %cst_18 = arith.constant dense<0.000000e+00> : vector<8x512xf32>
    %18 = tpu.matmul %16, %17, %cst_18 {dimension_numbers = #tpu.dot_dimension_numbers<[1], [0], [0], [1], [0, 0, 1, 1], [], []>} : vector<8x512xbf16>, vector<512x512xbf16>, vector<8x512xf32> -> vector<8x512xf32>
    %c0_19 = arith.constant 0 : index
    %c0_20 = arith.constant 0 : index
    %19 = vector.load %arg9[%c0_19, %c0_20] : memref<1x512xf32, #tpu.memory_space<vmem>>, vector<1x512xf32>
    %20 = vector.broadcast %19 : vector<1x512xf32> to vector<8x512xf32>
    %21 = arith.addf %18, %20 : vector<8x512xf32>
    %cst_21 = arith.constant 0.000000e+00 : f32
    %22 = vector.broadcast %cst_21 : f32 to vector<8x512xf32>
    %23 = arith.maximumf %21, %22 : vector<8x512xf32>
    %24 = arith.truncf %23 : vector<8x512xf32> to vector<8x512xbf16>
    %c0_22 = arith.constant 0 : index
    %c0_23 = arith.constant 0 : index
    %25 = vector.load %arg10[%c0_22, %c0_23] : memref<512x2xbf16, #tpu.memory_space<vmem>>, vector<512x2xbf16>
    %cst_24 = arith.constant dense<0.000000e+00> : vector<8x2xf32>
    %26 = tpu.matmul %24, %25, %cst_24 {dimension_numbers = #tpu.dot_dimension_numbers<[1], [0], [0], [1], [0, 0, 1, 1], [], []>} : vector<8x512xbf16>, vector<512x2xbf16>, vector<8x2xf32> -> vector<8x2xf32>
    %c0_25 = arith.constant 0 : index
    %c0_26 = arith.constant 0 : index
    %27 = vector.load %arg11[%c0_25, %c0_26] : memref<1x2xf32, #tpu.memory_space<vmem>>, vector<1x2xf32>
    %28 = vector.broadcast %27 : vector<1x2xf32> to vector<8x2xf32>
    %29 = arith.addf %26, %28 : vector<8x2xf32>
    %c0_27 = arith.constant 0 : index
    %c0_28 = arith.constant 0 : index
    %30 = vector.load %arg12[%c0_27, %c0_28] : memref<8x2xf32, #tpu.memory_space<vmem>>, vector<8x2xf32>
    tpu.vector_store %arg12[%c0_27, %c0_28], %29 {strides = array<i32>} : memref<8x2xf32, #tpu.memory_space<vmem>>, vector<8x2xf32>,
    return
  }
  func.func @transform_0(%arg0: i32) -> (i32, i32) {
    %c0_i32 = arith.constant 0 : i32
    %c0_i32_0 = arith.constant 0 : i32
    return %arg0, %c0_i32 : i32, i32
  }
  func.func @transform_1(%arg0: i32) -> (i32, i32) {
    %c0_i32 = arith.constant 0 : i32
    %c0_i32_0 = arith.constant 0 : i32
    return %arg0, %c0_i32 : i32, i32
  }
  func.func @transform_2(%arg0: i32) -> (i32, i32) {
    %c0_i32 = arith.constant 0 : i32
    %c0_i32_0 = arith.constant 0 : i32
    return %arg0, %c0_i32 : i32, i32
  }
  func.func @transform_3(%arg0: i32) -> (i32, i32) {
    %c0_i32 = arith.constant 0 : i32
    %c0_i32_0 = arith.constant 0 : i32
    %c0_i32_1 = arith.constant 0 : i32
    return %c0_i32, %c0_i32_0 : i32, i32
  }
  func.func @transform_4(%arg0: i32) -> (i32, i32) {
    %c0_i32 = arith.constant 0 : i32
    %c0_i32_0 = arith.constant 0 : i32
    %c0_i32_1 = arith.constant 0 : i32
    return %c0_i32, %c0_i32_0 : i32, i32
  }
  func.func @transform_5(%arg0: i32) -> (i32, i32) {
    %c0_i32 = arith.constant 0 : i32
    %c0_i32_0 = arith.constant 0 : i32
    %c0_i32_1 = arith.constant 0 : i32
    return %c0_i32, %c0_i32_0 : i32, i32
  }
  func.func @transform_6(%arg0: i32) -> (i32, i32) {
    %c0_i32 = arith.constant 0 : i32
    %c0_i32_0 = arith.constant 0 : i32
    %c0_i32_1 = arith.constant 0 : i32
    return %c0_i32, %c0_i32_0 : i32, i32
  }
  func.func @transform_7(%arg0: i32) -> (i32, i32) {
    %c0_i32 = arith.constant 0 : i32
    %c0_i32_0 = arith.constant 0 : i32
    %c0_i32_1 = arith.constant 0 : i32
    return %c0_i32, %c0_i32_0 : i32, i32
  }
  func.func @transform_8(%arg0: i32) -> (i32, i32) {
    %c0_i32 = arith.constant 0 : i32
    %c0_i32_0 = arith.constant 0 : i32
    %c0_i32_1 = arith.constant 0 : i32
    return %c0_i32, %c0_i32_0 : i32, i32
  }
  func.func @transform_9(%arg0: i32) -> (i32, i32) {
    %c0_i32 = arith.constant 0 : i32
    %c0_i32_0 = arith.constant 0 : i32
    %c0_i32_1 = arith.constant 0 : i32
    return %c0_i32, %c0_i32_0 : i32, i32
  }
  func.func @transform_10(%arg0: i32) -> (i32, i32) {
    %c0_i32 = arith.constant 0 : i32
    %c0_i32_0 = arith.constant 0 : i32
    %c0_i32_1 = arith.constant 0 : i32
    return %c0_i32, %c0_i32_0 : i32, i32
  }
  func.func @transform_11(%arg0: i32) -> (i32, i32) {
    %c0_i32 = arith.constant 0 : i32
    %c0_i32_0 = arith.constant 0 : i32
    return %arg0, %c0_i32 : i32, i32
  }
}

</mosaic_0001>

<bundles_post_ra>
// kernel: critic_forward.1
= control target key start
LH: loop header
LB: loop body
LE: loop exit
PB: predicated region body
PF: predicated region fallthrough
CT: control target
= control target key end

     0   :  { %16 = vsyncpa [#allocation3], 0  ;;  %s2279_s17 = smov [#allocation2]   ;;  %s2543_s0 = inlined_call_operand.vmem [shape: bf16[8,17], index: 0, kind: input, shape index: {}]   ;;  %s2544_s1 = inlined_call_operand.vmem [shape: bf16[8,6], index: 1, kind: input, shape index: {}]   ;;  %s2545_s2 = inlined_call_operand.vmem [shape: bf16[8,4], index: 2, kind: input, shape index: {}]   ;;  %s2546_s3 = inlined_call_operand.vmem [shape: bf16[17,512], index: 3, kind: input, shape index: {}]   ;;  %s2547_s4 = inlined_call_operand.vmem [shape: bf16[6,512], index: 4, kind: input, shape index: {}]   ;;  %s2548_s5 = inlined_call_operand.vmem [shape: bf16[4,512], index: 5, kind: input, shape index: {}]   ;;  %s2549_s6 = inlined_call_operand.vmem [shape: f32[1,512], index: 6, kind: input, shape index: {}]   ;;  %s2550_s7 = inlined_call_operand.hbm [shape: bf16[512,512], index: 7, kind: input, shape index: {}]   ;;  %s2551_s8 = inlined_call_operand.vmem [shape: f32[1,512], index: 8, kind: input, shape index: {}]   ;;  %s2552_s9 = inlined_call_operand.vmem [shape: bf16[512,2], index: 9, kind: input, shape index: {}]   ;;  %s2553_s10 = inlined_call_operand.vmem [shape: f32[1,2], index: 10, kind: input, shape index: {}]   ;;  %s2554_s11 = inlined_call_operand.vmem [shape: f32[8,2], index: 11, kind: output, shape index: {}]  }
   0x1   :  { %s36_s18 = sshll.u32 %s2279_s17, 4  ;;  %s2255_s21 = scalar_lea.hbm %s2550_s7, 16384  ;;  %s37_s18 = int_to_ptr.vmem [resolvable:$true] %s36_s18 }
   0x2   :  { %p2256_p0 = scmp.ne.s32.totalorder %s2550_s7, %s2255_s21  ;;  %p2259_p1 = scmp.lt.u32.totalorder %s2255_s21, %s2550_s7 }
   0x4   :  { %p2261_p2 = pnand %p2259_p1, %p2256_p0 }
   0x6   :  { %2264 = shalt.err (!%p2261_p2)
}
   0x7   :  { %s2265_s26 = scalar_lea.vmem %s37_s18, 16384  ;;  %p2270_p4 = scmp.lt.s32.totalorder %s37_s18, %s37_s18 }
   0x8   :  { %p2266_p3 = scmp.ne.s32.totalorder %s37_s18, %s2265_s26  ;;  %p2271_p5 = scmp.lt.s32.totalorder %s2265_s26, %s2265_s26 }
   0xa   :  { %p2272_p6 = por %p2271_p5, %p2270_p4 }
   0xc   :  { %p2273_p7 = pnand %p2272_p6, %p2266_p3 }
   0xe   :  { %2276 = shalt.err (!%p2273_p7)
}
   0xf   :  { %s2280_s27 = smov 256   ;;  %s2281_s28 = smov 16  }
  0x10   :  { %42 = dma.hbm_to_vmem [thread:$0]  %s2550_s7, 16384, %s37_s18, [#allocation3], %s2280_s27, %s2280_s27, %s2281_s28  }
  0x11   :  { %2277 = dma.done.wait [#allocation3], 16384  }
  0x12   :  { %2278 = vsyncadd [#allocation3], 4294950912  ;;  %v2282_v0 = vmov 0   ;;  %v310_v1 = vlaneseq  ;;  %v2283_v2 = vmov 1983009808   ;;  %vm206_vm0 = vcmask 1040384  }
  0x13   :  { %122 = vmatprep.mubr.bf16.mxu0 %v2282_v0  ;;  %163 = vmatprep.mubr.bf16.mxu1 %v2282_v0  ;;  %v308_v3 = vunpack.c.l.s4 %v2283_v2  ;;  %v61_v6 = vld [vmem:[%s2547_s4] sm:$0x77]  ;;  %vm77_vm1 = vcmask 1042432   ;;  %v208_v12 = vsel %vm206_vm0, 65535, %v2282_v0  ;;  %v62_v17 = vld [vmem:[%s2547_s4 + $0x8] sm:$0x77] }
  0x14   :  { %v2358_v5 = vshrl.u32 %v310_v1, 7  ;;  %v1773_v7 = vcombine.high %v61_v6, %v61_v6  ;;  %v1772_v8 = vcombine.low %v61_v6, %v61_v6  ;;  %v2020_v9 = vld [vmem:[%s2546_s3 + $0x4] ss:$16 sps:$4 sm:$0xff]   ;;  %v60_v15 = vld [vmem:[%s2544_s1] sm:$0xf]  ;;  %vm73_vm2 = vcmask 48128  }
  0x15   :  { %v309_v4 = vunpack.c.0.s8 %v308_v3  ;;  %v58_v11 = vld [vmem:[%s2546_s3 + $0x20] sm:$0x11]  ;;  %v1775_v20 = vcombine.high %v62_v17, %v62_v17  ;;  %v1774_v21 = vcombine.low %v62_v17, %v62_v17  ;;  %v2027_v22 = vld [vmem:[%s2546_s3 + $0xc] ss:$16 sps:$4 sm:$0xff]   ;;  %v2025_v29 = vld [vmem:[%s2546_s3 + $0x8] ss:$16 sps:$4 sm:$0xff]  }
  0x16   :  { %v304_v13 = vld [vmem:[%s2548_s5] sm:$0xff]  ;;  %1776 = vmatprep.subr.msk.bf16.mxu0 %vm77_vm1, %v1773_v7  ;;  %v79_v14 = vsel %vm77_vm1, %v1772_v8, 0  ;;  %v1785_v16 = vcombine.high %v58_v11, %v58_v11  ;;  %v1784_v19 = vcombine.low %v58_v11, %v58_v11  ;;  %v59_v25 = vld [vmem:[%s2546_s3 + $0x28] sm:$0x11]  ;;  %vm327_vm3 = vcmask 1041408  }
  0x17   :  { %v312_v10 = vsub.s32 %v309_v4, %v2358_v5  ;;  %91 = vmatpush1.bf16.msra.mxu0 %v79_v14  ;;  %v2018_v18 = vld [vmem:[%s2546_s3] ss:$16 sps:$4 sm:$0xff]   ;;  %v306_v26 = vcombine.high %v304_v13, %v304_v13  ;;  %1778 = vmatprep.subr.msk.bf16.mxu1 %vm77_vm1, %v1775_v20  ;;  %v85_v27 = vsel %vm77_vm1, %v1774_v21, 0  ;;  %v1787_v28 = vcombine.high %v59_v25, %v59_v25  ;;  %v2033_v39 = vld [vmem:[#allocation2 + $0x4] ss:$16 sps:$4 sm:$0xff]  }
  0x18   :  { %221 = vmatprep.subr.bf16.mxu0 %v2020_v9  ;;  %v213_v23 = vand.u32 %v1785_v16, %v208_v12  ;;  %132 = vmatpush1.bf16.msra.mxu1 %v85_v27  ;;  %v1786_v30 = vcombine.low %v59_v25, %v59_v25  ;;  %v210_v31 = vand.u32 %v1784_v19, %v208_v12  ;;  %v53_v36 = vld [vmem:[%s2543_s0] sm:$0xf]  ;;  %vm202_vm4 = vcmask 138240   ;;  %v2036_v41 = vld [vmem:[#allocation2 + $0xc] ss:$16 sps:$4 sm:$0xff]  }
  0x19   :  { %v313_v24 = vrot.slane %v304_v13, %v312_v10  ;;  %v219_v32 = vand.u32 %v1787_v28, %v208_v12  ;;  %262 = vmatprep.subr.bf16.mxu1 %v2027_v22  ;;  %v320_v34 = vrot.slane %v306_v26, %v312_v10  ;;  %v303_v42 = vld [vmem:[%s2545_s2] sm:$0xf]  ;;  %vm323_vm5 = vcmask 31744   ;;  %v2039_v44 = vld [vmem:[#allocation2 + $0x24] ss:$16 sps:$4 sm:$0xff]  }
  0x1a   :  { %1777 = vmatmul.mubr.msk.bf16.vlgmr.msra.gmra.mrb[0].mxu0 %vm73_vm2, %v60_v15  ;;  %v216_v35 = vand.u32 %v1786_v30, %v208_v12  ;;  %v2031_v43 = vld [vmem:[#allocation2] ss:$16 sps:$4 sm:$0xff]   ;;  %v2034_v45 = vld [vmem:[#allocation2 + $0x8] ss:$16 sps:$4 sm:$0xff]   ;;  %v2042_v47 = vld [vmem:[#allocation2 + $0x2c] ss:$16 sps:$4 sm:$0xff]  }
  0x1b   :  { %222 = vmatpush1.bf16.msra.mxu0 %v2018_v18  ;;  %253 = vmatprep.mubr.bf16.mxu0 %v2282_v0  ;;  %v321_v33 = vcombine.high %v313_v24, %v313_v24  ;;  %v329_v37 = vsel %vm327_vm3, %v313_v24, 0  ;;  %v322_v38 = vcombine.high %v320_v34, %v320_v34  ;;  %v335_v40 = vsel %vm327_vm3, %v320_v34, 0  ;;  %v2037_v46 = vld [vmem:[#allocation2 + $0x20] ss:$16 sps:$4 sm:$0xff]   ;;  %v2045_v48 = vld [vmem:[#allocation2 + $0x44] ss:$16 sps:$4 sm:$0xff]  }
  0x1c   :  { %223 = vmatprep.subr.bf16.mxu0 %v213_v23  ;;  %1779 = vmatmul.mubr.msk.bf16.vlgmr.msra.gmra.mrb[0].mxu1 %vm73_vm2, %v60_v15  ;;  %v2040_v49 = vld [vmem:[#allocation2 + $0x28] ss:$16 sps:$4 sm:$0xff]   ;;  %v2043_v50 = vld [vmem:[#allocation2 + $0x40] ss:$16 sps:$4 sm:$0xff]   ;;  %v2048_v51 = vld [vmem:[#allocation2 + $0x4c] ss:$16 sps:$4 sm:$0xff]  }
  0x1d   :  { %263 = vmatpush1.bf16.msra.mxu1 %v2025_v29  ;;  %294 = vmatprep.mubr.bf16.mxu1 %v2282_v0  ;;  %v2051_v52 = vld [vmem:[#allocation2 + $0x64] ss:$16 sps:$4 sm:$0xff]   ;;  %v2046_v53 = vld [vmem:[#allocation2 + $0x48] ss:$16 sps:$4 sm:$0xff]   ;;  %v2049_v54 = vld [vmem:[#allocation2 + $0x60] ss:$16 sps:$4 sm:$0xff]  }
  0x1e   :  { %264 = vmatprep.subr.bf16.mxu1 %v219_v32  ;;  %v2054_v55 = vld [vmem:[#allocation2 + $0x6c] ss:$16 sps:$4 sm:$0xff]   ;;  %v2057_v56 = vld [vmem:[#allocation2 + $0x84] ss:$16 sps:$4 sm:$0xff]   ;;  %v2052_v57 = vld [vmem:[#allocation2 + $0x68] ss:$16 sps:$4 sm:$0xff]  }
  0x1f   :  { %224 = vmatpush1.bf16.msra.mxu0 %v210_v31  ;;  %v2055_v58 = vld [vmem:[#allocation2 + $0x80] ss:$16 sps:$4 sm:$0xff]   ;;  %v2060_v59 = vld [vmem:[#allocation2 + $0x8c] ss:$16 sps:$4 sm:$0xff]   ;;  %v2063_v60 = vld [vmem:[#allocation2 + $0xa4] ss:$16 sps:$4 sm:$0xff]  }
  0x20   :  { %1790 = vmatprep.subr.msk.bf16.mxu0 %vm327_vm3, %v321_v33  ;;  %v2058_v61 = vld [vmem:[#allocation2 + $0x88] ss:$16 sps:$4 sm:$0xff]   ;;  %v2061_v62 = vld [vmem:[#allocation2 + $0xa0] ss:$16 sps:$4 sm:$0xff]   ;;  %v2066_v63 = vld [vmem:[#allocation2 + $0xac] ss:$16 sps:$4 sm:$0xff]  }
  0x21   :  { %265 = vmatpush1.bf16.msra.mxu1 %v216_v35  ;;  %v2064_v1 = vld [vmem:[#allocation2 + $0xa8] ss:$16 sps:$4 sm:$0xff]   ;;  %v2067_v2 = vld [vmem:[#allocation2 + $0xc0] ss:$16 sps:$4 sm:$0xff]   ;;  %v2072_v3 = vld [vmem:[#allocation2 + $0xcc] ss:$16 sps:$4 sm:$0xff]  }
  0x22   :  { %1788 = vmatmul.mubr.msk.bf16.vlgmr.msra.gmra.mrb[4].mxu0 %vm202_vm4, %v53_v36  ;;  %1792 = vmatprep.subr.msk.bf16.mxu1 %vm327_vm3, %v322_v38  ;;  %v2075_v4 = vld [vmem:[#allocation2 + $0xe4] ss:$16 sps:$4 sm:$0xff]   ;;  %v2070_v6 = vld [vmem:[#allocation2 + $0xc8] ss:$16 sps:$4 sm:$0xff]   ;;  %v2073_v7 = vld [vmem:[#allocation2 + $0xe0] ss:$16 sps:$4 sm:$0xff]  }
  0x23   :  { %341 = vmatpush1.bf16.msra.mxu0 %v329_v37  ;;  %372 = vmatprep.mubr.bf16.mxu0 %v2282_v0  ;;  %v2078_v8 = vld [vmem:[#allocation2 + $0xec] ss:$16 sps:$4 sm:$0xff]   ;;  %v2081_v9 = vld [vmem:[#allocation2 + $0x104] ss:$16 sps:$4 sm:$0xff]   ;;  %v2076_v10 = vld [vmem:[#allocation2 + $0xe8] ss:$16 sps:$4 sm:$0xff]  }
  0x24   :  { %1250 = vmatprep.subr.bf16.mxu0 %v2033_v39  ;;  %1789 = vmatmul.mubr.msk.bf16.vlgmr.msra.gmra.mrb[4].mxu1 %vm202_vm4, %v53_v36  ;;  %v2079_v11 = vld [vmem:[#allocation2 + $0x100] ss:$16 sps:$4 sm:$0xff]   ;;  %v2084_v12 = vld [vmem:[#allocation2 + $0x10c] ss:$16 sps:$4 sm:$0xff]   ;;  %v2087_v13 = vld [vmem:[#allocation2 + $0x124] ss:$16 sps:$4 sm:$0xff]  }
  0x25   :  { %382 = vmatpush1.bf16.msra.mxu1 %v335_v40  ;;  %413 = vmatprep.mubr.bf16.mxu1 %v2282_v0  ;;  %v2069_v0 = vld [vmem:[#allocation2 + $0xc4] ss:$16 sps:$4 sm:$0xff]   ;;  %v2082_v14 = vld [vmem:[#allocation2 + $0x108] ss:$16 sps:$4 sm:$0xff]   ;;  %v2085_v15 = vld [vmem:[#allocation2 + $0x120] ss:$16 sps:$4 sm:$0xff]  }
  0x26   :  { %1332 = vmatprep.subr.bf16.mxu1 %v2036_v41  ;;  %v2090_v16 = vld [vmem:[#allocation2 + $0x12c] ss:$16 sps:$4 sm:$0xff]   ;;  %v2088_v17 = vld [vmem:[#allocation2 + $0x128] ss:$16 sps:$4 sm:$0xff]   ;;  %v2093_v18 = vld [vmem:[#allocation2 + $0x144] ss:$16 sps:$4 sm:$0xff]  }
  0x27   :  { %v2096_v19 = vld [vmem:[#allocation2 + $0x14c] ss:$16 sps:$4 sm:$0xff]   ;;  %v2091_v20 = vld [vmem:[#allocation2 + $0x140] ss:$16 sps:$4 sm:$0xff]   ;;  %v2094_v21 = vld [vmem:[#allocation2 + $0x148] ss:$16 sps:$4 sm:$0xff]  }
  0x28   :  { %v2097_v22 = vld [vmem:[#allocation2 + $0x160] ss:$16 sps:$4 sm:$0xff]   ;;  %v2099_v23 = vld [vmem:[#allocation2 + $0x164] ss:$16 sps:$4 sm:$0xff]   ;;  %v2100_v24 = vld [vmem:[#allocation2 + $0x168] ss:$16 sps:$4 sm:$0xff]  }
  0x29   :  { %v2102_v25 = vld [vmem:[#allocation2 + $0x16c] ss:$16 sps:$4 sm:$0xff]   ;;  %v2105_v26 = vld [vmem:[#allocation2 + $0x184] ss:$16 sps:$4 sm:$0xff]   ;;  %v2103_v28 = vld [vmem:[#allocation2 + $0x180] ss:$16 sps:$4 sm:$0xff]  }
  0x2a   :  { %1791 = vmatmul.mubr.msk.bf16.vlgmr.msra.gmra.mrb[8].mxu0 %vm323_vm5, %v303_v42  ;;  %v2108_v27 = vld [vmem:[#allocation2 + $0x18c] ss:$16 sps:$4 sm:$0xff]   ;;  %v2106_v29 = vld [vmem:[#allocation2 + $0x188] ss:$16 sps:$4 sm:$0xff]   ;;  %v2109_v30 = vld [vmem:[#allocation2 + $0x1a0] ss:$16 sps:$4 sm:$0xff]  }
  0x2b   :  { %1251 = vmatpush1.bf16.msra.mxu0 %v2031_v43  ;;  %v2111_v31 = vld [vmem:[#allocation2 + $0x1a4] ss:$16 sps:$4 sm:$0xff]   ;;  %v2112_v32 = vld [vmem:[#allocation2 + $0x1a8] ss:$16 sps:$4 sm:$0xff]   ;;  %v2114_v33 = vld [vmem:[#allocation2 + $0x1ac] ss:$16 sps:$4 sm:$0xff]  }
  0x2c   :  { %1252 = vmatprep.subr.bf16.mxu0 %v2039_v44  ;;  %1793 = vmatmul.mubr.msk.bf16.vlgmr.msra.gmra.mrb[8].mxu1 %vm323_vm5, %v303_v42  ;;  %v2117_v34 = vld [vmem:[#allocation2 + $0x1c4] ss:$16 sps:$4 sm:$0xff]   ;;  %v2115_v35 = vld [vmem:[#allocation2 + $0x1c0] ss:$16 sps:$4 sm:$0xff]   ;;  %v2118_v36 = vld [vmem:[#allocation2 + $0x1c8] ss:$16 sps:$4 sm:$0xff]  }
  0x2d   :  { %1333 = vmatpush1.bf16.msra.mxu1 %v2034_v45  ;;  %v2120_v37 = vld [vmem:[#allocation2 + $0x1cc] ss:$16 sps:$4 sm:$0xff]   ;;  %v2123_v38 = vld [vmem:[#allocation2 + $0x1e4] ss:$16 sps:$4 sm:$0xff]   ;;  %v2121_v40 = vld [vmem:[#allocation2 + $0x1e0] ss:$16 sps:$4 sm:$0xff]  }
  0x2e   :  { %1334 = vmatprep.subr.bf16.mxu1 %v2042_v47  ;;  %v2126_v39 = vld [vmem:[#allocation2 + $0x1ec] ss:$16 sps:$4 sm:$0xff]   ;;  %v2124_v41 = vld [vmem:[#allocation2 + $0x1e8] ss:$16 sps:$4 sm:$0xff]   ;;  %v2129_v42 = vld [vmem:[#allocation2 + $0x204] ss:$16 sps:$4 sm:$0xff]  }
  0x2f   :  { %1253 = vmatpush1.bf16.msra.mxu0 %v2037_v46  ;;  %v2132_v43 = vld [vmem:[#allocation2 + $0x20c] ss:$16 sps:$4 sm:$0xff]   ;;  %vm1765_vm6 = vcmask 15360  }
  0x30   :  { %1254 = vmatprep.subr.bf16.mxu0 %v2045_v48 }
  0x31   :  { %1335 = vmatpush1.bf16.msra.mxu1 %v2040_v49 }
  0x32   :  { %1336 = vmatprep.subr.bf16.mxu1 %v2048_v51 }
  0x33   :  { %1255 = vmatpush1.bf16.msra.mxu0 %v2043_v50 }
  0x34   :  { %1256 = vmatprep.subr.bf16.mxu0 %v2051_v52 }
  0x35   :  { %1337 = vmatpush1.bf16.msra.mxu1 %v2046_v53 }
  0x36   :  { %1338 = vmatprep.subr.bf16.mxu1 %v2054_v55 }
  0x37   :  { %1257 = vmatpush1.bf16.msra.mxu0 %v2049_v54 }
  0x38   :  { %1258 = vmatprep.subr.bf16.mxu0 %v2057_v56 }
  0x39   :  { %1339 = vmatpush1.bf16.msra.mxu1 %v2052_v57 }
  0x3a   :  { %1340 = vmatprep.subr.bf16.mxu1 %v2060_v59 }
  0x3b   :  { %1259 = vmatpush1.bf16.msra.mxu0 %v2055_v58  ;;  %v430_v58 = vsub.s32 0, %v2358_v5 }
  0x3c   :  { %1260 = vmatprep.subr.bf16.mxu0 %v2063_v60  ;;  %v426_v60 = vld [vmem:[%s2549_s6] sm:$0xf] }
  0x3d   :  { %1341 = vmatpush1.bf16.msra.mxu1 %v2058_v61  ;;  %v434_v61 = vsub.s32 1, %v2358_v5 }
  0x3e   :  { %1342 = vmatprep.subr.bf16.mxu1 %v2066_v63 }
  0x3f   :  { %1261 = vmatpush1.bf16.msra.mxu0 %v2061_v62 }
  0x40   :  { %1262 = vmatprep.subr.bf16.mxu0 %v2069_v0 }
  0x41   :  { %1343 = vmatpush1.bf16.msra.mxu1 %v2064_v1 }
  0x42   :  { %1344 = vmatprep.subr.bf16.mxu1 %v2072_v3  ;;  %v438_v3 = vsub.s32 2, %v2358_v5 }
  0x43   :  { %1263 = vmatpush1.bf16.msra.mxu0 %v2067_v2 }
  0x44   :  { %1264 = vmatprep.subr.bf16.mxu0 %v2075_v4  ;;  %v431_v4 = vrot.slane %v426_v60, %v430_v58 }
  0x45   :  { %1345 = vmatpush1.bf16.msra.mxu1 %v2070_v6  ;;  %v442_v6 = vsub.s32 3, %v2358_v5 }
  0x46   :  { %1346 = vmatprep.subr.bf16.mxu1 %v2078_v8  ;;  %v435_v8 = vrot.slane %v426_v60, %v434_v61 }
  0x47   :  { %1265 = vmatpush1.bf16.msra.mxu0 %v2073_v7 }
  0x48   :  { %1266 = vmatprep.subr.bf16.mxu0 %v2081_v9 }
  0x49   :  { %1347 = vmatpush1.bf16.msra.mxu1 %v2076_v10 }
  0x4a   :  { %1348 = vmatprep.subr.bf16.mxu1 %v2084_v12 }
  0x4b   :  { %1267 = vmatpush1.bf16.msra.mxu0 %v2079_v11 }
  0x4c   :  { %1268 = vmatprep.subr.bf16.mxu0 %v2087_v13  ;;  %v439_v13 = vrot.slane %v426_v60, %v438_v3 }
  0x4d   :  { %1349 = vmatpush1.bf16.msra.mxu1 %v2082_v14 }
  0x4e   :  { %1350 = vmatprep.subr.bf16.mxu1 %v2090_v16 }
  0x4f   :  { %1269 = vmatpush1.bf16.msra.mxu0 %v2085_v15 }
  0x50   :  { %1270 = vmatprep.subr.bf16.mxu0 %v2093_v18 }
  0x51   :  { %1351 = vmatpush1.bf16.msra.mxu1 %v2088_v17  ;;  %v443_v17 = vrot.slane %v426_v60, %v442_v6  ;;  %v2174_v60 = vld [vmem:[#allocation2 + $0x2ec] ss:$16 sps:$4 sm:$0xff]  }
  0x52   :  { %1352 = vmatprep.subr.bf16.mxu1 %v2096_v19 }
  0x53   :  { %1271 = vmatpush1.bf16.msra.mxu0 %v2091_v20 }
  0x54   :  { %1272 = vmatprep.subr.bf16.mxu0 %v2099_v23 }
  0x55   :  { %1353 = vmatpush1.bf16.msra.mxu1 %v2094_v21 }
  0x56   :  { %1354 = vmatprep.subr.bf16.mxu1 %v2102_v25 }
  0x57   :  { %1273 = vmatpush1.bf16.msra.mxu0 %v2097_v22 }
  0x58   :  { %1274 = vmatprep.subr.bf16.mxu0 %v2105_v26 }
  0x59   :  { %1355 = vmatpush1.bf16.msra.mxu1 %v2100_v24 }
  0x5a   :  { %1356 = vmatprep.subr.bf16.mxu1 %v2108_v27 }
  0x5b   :  { %1275 = vmatpush1.bf16.msra.mxu0 %v2103_v28 }
  0x5c   :  { %1276 = vmatprep.subr.bf16.mxu0 %v2111_v31 }
  0x5d   :  { %1357 = vmatpush1.bf16.msra.mxu1 %v2106_v29  ;;  %v2127_v29 = vld [vmem:[#allocation2 + $0x200] ss:$16 sps:$4 sm:$0xff]  }
  0x5e   :  { %1358 = vmatprep.subr.bf16.mxu1 %v2114_v33  ;;  %v2138_v33 = vld [vmem:[#allocation2 + $0x22c] ss:$16 sps:$4 sm:$0xff]  }
  0x5f   :  { %1277 = vmatpush1.bf16.msra.mxu0 %v2109_v30  ;;  %v2130_v30 = vld [vmem:[#allocation2 + $0x208] ss:$16 sps:$4 sm:$0xff]  }
  0x60   :  { %1278 = vmatprep.subr.bf16.mxu0 %v2117_v34 }
  0x61   :  { %1359 = vmatpush1.bf16.msra.mxu1 %v2112_v32  ;;  %v2135_v32 = vld [vmem:[#allocation2 + $0x224] ss:$16 sps:$4 sm:$0xff]  }
  0x62   :  { %1360 = vmatprep.subr.bf16.mxu1 %v2120_v37  ;;  %v2136_v37 = vld [vmem:[#allocation2 + $0x228] ss:$16 sps:$4 sm:$0xff]  }
  0x63   :  { %1279 = vmatpush1.bf16.msra.mxu0 %v2115_v35 }
  0x64   :  { %1280 = vmatprep.subr.bf16.mxu0 %v2123_v38  ;;  %v2141_v38 = vld [vmem:[#allocation2 + $0x244] ss:$16 sps:$4 sm:$0xff]  }
  0x65   :  { %1361 = vmatpush1.bf16.msra.mxu1 %v2118_v36  ;;  %v2133_v36 = vld [vmem:[#allocation2 + $0x220] ss:$16 sps:$4 sm:$0xff]  }
  0x66   :  { %1362 = vmatprep.subr.bf16.mxu1 %v2126_v39  ;;  %v2144_v39 = vld [vmem:[#allocation2 + $0x24c] ss:$16 sps:$4 sm:$0xff]  }
  0x67   :  { %1281 = vmatpush1.bf16.msra.mxu0 %v2121_v40  ;;  %v2139_v40 = vld [vmem:[#allocation2 + $0x240] ss:$16 sps:$4 sm:$0xff]  }
  0x68   :  { %1291 = vmatprep.subr.bf16.mxu0 %v2129_v42  ;;  %v2147_v42 = vld [vmem:[#allocation2 + $0x264] ss:$16 sps:$4 sm:$0xff]  }
  0x69   :  { %1363 = vmatpush1.bf16.msra.mxu1 %v2124_v41  ;;  %v2142_v41 = vld [vmem:[#allocation2 + $0x248] ss:$16 sps:$4 sm:$0xff]  }
  0x6a   :  { %1373 = vmatprep.subr.bf16.mxu1 %v2132_v43  ;;  %v2150_v43 = vld [vmem:[#allocation2 + $0x26c] ss:$16 sps:$4 sm:$0xff]  }
  0xed   :  { %v124_v44 = vpop.f32.mrb[0].mxu0 }
  0xee   :  { %v126_v45 = vpop.f32.mrb[1].mxu0 }
  0xef   :  { %v128_v46 = vpop.f32.mrb[2].mxu0  ;;  %v165_v48 = vpop.f32.mrb[0].mxu1 }
  0xf0   :  { %v129_v47 = vpop.f32.mrb[3].mxu0  ;;  %v167_v49 = vpop.f32.mrb[1].mxu1  ;;  %v2153_v46 = vld [vmem:[#allocation2 + $0x284] ss:$16 sps:$4 sm:$0xff]  }
  0xf1   :  { %v169_v50 = vpop.f32.mrb[2].mxu1  ;;  %v2156_v47 = vld [vmem:[#allocation2 + $0x28c] ss:$16 sps:$4 sm:$0xff]  }
  0xf2   :  { %v170_v51 = vpop.f32.mrb[3].mxu1  ;;  %v2159_v50 = vld [vmem:[#allocation2 + $0x2a4] ss:$16 sps:$4 sm:$0xff]  }
  0xf3   :  { %v2162_v51 = vld [vmem:[#allocation2 + $0x2ac] ss:$16 sps:$4 sm:$0xff]  }
  0xf5   :  { %v255_v52 = vpop.f32.mrb[4].mxu0 }
  0xf6   :  { %v256_v53 = vadd.f32 %v255_v52, %v124_v44  ;;  %v257_v54 = vpop.f32.mrb[5].mxu0  ;;  %v2145_v44 = vld [vmem:[#allocation2 + $0x260] ss:$16 sps:$4 sm:$0xff]  }
  0xf7   :  { %v258_v55 = vadd.f32 %v257_v54, %v126_v45  ;;  %v259_v56 = vpop.f32.mrb[6].mxu0  ;;  %v296_v59 = vpop.f32.mrb[4].mxu1  ;;  %v2148_v45 = vld [vmem:[#allocation2 + $0x268] ss:$16 sps:$4 sm:$0xff]   ;;  %v2157_v52 = vld [vmem:[#allocation2 + $0x2a0] ss:$16 sps:$4 sm:$0xff]  }
  0xf8   :  { %v260_v57 = vpop.f32.mrb[7].mxu0  ;;  %v297_v62 = vadd.f32 %v296_v59, %v165_v48  ;;  %v298_v63 = vpop.f32.mrb[5].mxu1  ;;  %v2151_v48 = vld [vmem:[#allocation2 + $0x280] ss:$16 sps:$4 sm:$0xff]   ;;  %v2165_v54 = vld [vmem:[#allocation2 + $0x2c4] ss:$16 sps:$4 sm:$0xff]  }
  0xf9   :  { %v299_v0 = vadd.f32 %v298_v63, %v167_v49  ;;  %v300_v1 = vpop.f32.mrb[6].mxu1  ;;  %v2154_v49 = vld [vmem:[#allocation2 + $0x288] ss:$16 sps:$4 sm:$0xff]   ;;  %v2163_v56 = vld [vmem:[#allocation2 + $0x2c0] ss:$16 sps:$4 sm:$0xff]  }
  0xfa   :  { %v301_v2 = vpop.f32.mrb[7].mxu1  ;;  %v2166_v57 = vld [vmem:[#allocation2 + $0x2c8] ss:$16 sps:$4 sm:$0xff]   ;;  %v2171_v59 = vld [vmem:[#allocation2 + $0x2e4] ss:$16 sps:$4 sm:$0xff]  }
  0xfb   :  { %v2172_v63 = vld [vmem:[#allocation2 + $0x2e8] ss:$16 sps:$4 sm:$0xff]   ;;  %v2180_v1 = vld [vmem:[#allocation2 + $0x30c] ss:$16 sps:$4 sm:$0xff]   ;;  %v2175_v2 = vld [vmem:[#allocation2 + $0x300] ss:$16 sps:$4 sm:$0xff]  }
  0xfd   :  { %v374_v7 = vpop.f32.mrb[8].mxu0 }
  0xfe   :  { %v422_v9 = vadd.f32 %v374_v7, %v256_v53  ;;  %v376_v10 = vpop.f32.mrb[9].mxu0  ;;  %v2160_v53 = vld [vmem:[#allocation2 + $0x2a8] ss:$16 sps:$4 sm:$0xff]   ;;  %v2183_v7 = vld [vmem:[#allocation2 + $0x324] ss:$16 sps:$4 sm:$0xff]  }
  0xff   :  { %v423_v11 = vadd.f32 %v376_v10, %v258_v55  ;;  %v378_v12 = vpop.f32.mrb[10].mxu0  ;;  %v415_v16 = vpop.f32.mrb[8].mxu1  ;;  %v2168_v55 = vld [vmem:[#allocation2 + $0x2cc] ss:$16 sps:$4 sm:$0xff]   ;;  %v2184_v10 = vld [vmem:[#allocation2 + $0x328] ss:$16 sps:$4 sm:$0xff]  }
 0x100   :  { %v448_v14 = vadd.f32 %v431_v4, %v422_v9  ;;  %v379_v15 = vpop.f32.mrb[11].mxu0  ;;  %v424_v19 = vadd.f32 %v415_v16, %v297_v62  ;;  %v417_v20 = vpop.f32.mrb[9].mxu1  ;;  %v2169_v62 = vld [vmem:[#allocation2 + $0x2e0] ss:$16 sps:$4 sm:$0xff]   ;;  %v2178_v4 = vld [vmem:[#allocation2 + $0x308] ss:$16 sps:$4 sm:$0xff]  }
 0x101   :  { %v449_v18 = vadd.f32 %v435_v8, %v423_v11  ;;  %v425_v22 = vadd.f32 %v417_v20, %v299_v0  ;;  %v419_v23 = vpop.f32.mrb[10].mxu1  ;;  %v2177_v0 = vld [vmem:[#allocation2 + $0x304] ss:$16 sps:$4 sm:$0xff]   ;;  %v2186_v8 = vld [vmem:[#allocation2 + $0x32c] ss:$16 sps:$4 sm:$0xff]  }
 0x102   :  { %v452_v21 = vmax.f32 %v448_v14, 0.0  ;;  %v2427_v25 = vadd.f32 %v439_v13, %v424_v19  ;;  %v420_v26 = vpop.f32.mrb[11].mxu1  ;;  %v2181_v9 = vld [vmem:[#allocation2 + $0x320] ss:$16 sps:$4 sm:$0xff]   ;;  %v2189_v11 = vld [vmem:[#allocation2 + $0x344] ss:$16 sps:$4 sm:$0xff]  }
 0x103   :  { %v453_v24 = vmax.f32 %v449_v18, 0.0  ;;  %v451_v27 = vadd.f32 %v443_v17, %v425_v22  ;;  %v2192_v12 = vld [vmem:[#allocation2 + $0x34c] ss:$16 sps:$4 sm:$0xff]   ;;  %v2187_v13 = vld [vmem:[#allocation2 + $0x340] ss:$16 sps:$4 sm:$0xff]  }
 0x104   :  { %v456_v31 = vpack.c.bf16 %v452_v21, %v452_v21  ;;  %v2190_v14 = vld [vmem:[#allocation2 + $0x348] ss:$16 sps:$4 sm:$0xff]   ;;  %v2195_v15 = vld [vmem:[#allocation2 + $0x364] ss:$16 sps:$4 sm:$0xff]   ;;  %v2198_v16 = vld [vmem:[#allocation2 + $0x36c] ss:$16 sps:$4 sm:$0xff]  }
 0x105   :  { %v457_v28 = vpack.c.bf16 %v453_v24, %v453_v24  ;;  %v455_v34 = vmax.f32 %v451_v27, 0.0  ;;  %v2193_v17 = vld [vmem:[#allocation2 + $0x360] ss:$16 sps:$4 sm:$0xff]   ;;  %v2196_v18 = vld [vmem:[#allocation2 + $0x368] ss:$16 sps:$4 sm:$0xff]  }
 0x106   :  { %v2201_v19 = vld [vmem:[#allocation2 + $0x384] ss:$16 sps:$4 sm:$0xff]   ;;  %v2204_v20 = vld [vmem:[#allocation2 + $0x38c] ss:$16 sps:$4 sm:$0xff]   ;;  %v2199_v21 = vld [vmem:[#allocation2 + $0x380] ss:$16 sps:$4 sm:$0xff]  }
 0x107   :  { %1282 = vmatprep.mubr.bf16.mxu0 %v457_v28  ;;  %1364 = vmatprep.mubr.bf16.mxu1 %v457_v28  ;;  %v459_v35 = vpack.c.bf16 %v455_v34, %v455_v34  ;;  %v2202_v22 = vld [vmem:[#allocation2 + $0x388] ss:$16 sps:$4 sm:$0xff]   ;;  %v2207_v23 = vld [vmem:[#allocation2 + $0x3a4] ss:$16 sps:$4 sm:$0xff]   ;;  %v2210_v24 = vld [vmem:[#allocation2 + $0x3ac] ss:$16 sps:$4 sm:$0xff]  }
 0x108   :  { %1283 = vmatmul.mubr.bf16.vlgmr.msra.gmra.mrb[12].mxu0 %v456_v31  ;;  %1365 = vmatmul.mubr.bf16.vlgmr.msra.gmra.mrb[12].mxu1 %v456_v31  ;;  %v2205_v26 = vld [vmem:[#allocation2 + $0x3a0] ss:$16 sps:$4 sm:$0xff]   ;;  %v2208_v27 = vld [vmem:[#allocation2 + $0x3a8] ss:$16 sps:$4 sm:$0xff]   ;;  %v2213_v28 = vld [vmem:[#allocation2 + $0x3c4] ss:$16 sps:$4 sm:$0xff]  }
 0x109   :  { %1292 = vmatpush1.bf16.msra.mxu0 %v2127_v29  ;;  %1374 = vmatpush1.bf16.msra.mxu1 %v2130_v30  ;;  %v2216_v29 = vld [vmem:[#allocation2 + $0x3cc] ss:$16 sps:$4 sm:$0xff]   ;;  %v2211_v30 = vld [vmem:[#allocation2 + $0x3c0] ss:$16 sps:$4 sm:$0xff]   ;;  %v2214_v31 = vld [vmem:[#allocation2 + $0x3c8] ss:$16 sps:$4 sm:$0xff]  }
 0x10a   :  { %1293 = vmatprep.subr.bf16.mxu0 %v2135_v32  ;;  %1375 = vmatprep.subr.bf16.mxu1 %v2138_v33  ;;  %v2219_v32 = vld [vmem:[#allocation2 + $0x3e4] ss:$16 sps:$4 sm:$0xff]   ;;  %v2222_v33 = vld [vmem:[#allocation2 + $0x3ec] ss:$16 sps:$4 sm:$0xff]   ;;  %v2217_v34 = vld [vmem:[#allocation2 + $0x3e0] ss:$16 sps:$4 sm:$0xff]  }
 0x10b   :  { %1323 = vmatprep.mubr.bf16.mxu0 %v459_v35  ;;  %1405 = vmatprep.mubr.bf16.mxu1 %v459_v35  ;;  %v2220_v35 = vld [vmem:[#allocation2 + $0x3e8] ss:$16 sps:$4 sm:$0xff]  }
 0x10d   :  { %1294 = vmatpush1.bf16.msra.mxu0 %v2133_v36  ;;  %1376 = vmatpush1.bf16.msra.mxu1 %v2136_v37  ;;  %v454_v36 = vmax.f32 %v2427_v25, 0.0  ;;  %v2223_v37 = vld [vmem:[%s2552_s9 + $0x40] sm:$0xff]  }
 0x10e   :  { %1295 = vmatprep.subr.bf16.mxu0 %v2141_v38  ;;  %1377 = vmatprep.subr.bf16.mxu1 %v2144_v39  ;;  %v2224_v38 = vld [vmem:[%s2552_s9 + $0xc0] sm:$0xff]  }
 0x10f   :  { %v2225_v39 = vld [vmem:[%s2552_s9] sm:$0xff]  }
 0x110   :  { %v2226_v25 = vld [vmem:[%s2552_s9 + $0x80] sm:$0xff]  }
 0x111   :  { %1296 = vmatpush1.bf16.msra.mxu0 %v2139_v40  ;;  %1378 = vmatpush1.bf16.msra.mxu1 %v2142_v41  ;;  %v458_v40 = vpack.c.bf16 %v454_v36, %v454_v36  ;;  %v2227_v41 = vld [vmem:[%s2552_s9 + $0x48] sm:$0xff]  }
 0x112   :  { %1297 = vmatprep.subr.bf16.mxu0 %v2147_v42  ;;  %1379 = vmatprep.subr.bf16.mxu1 %v2150_v43  ;;  %v2228_v42 = vld [vmem:[%s2552_s9 + $0xc8] sm:$0xff]  }
 0x113   :  { %v2229_v43 = vld [vmem:[%s2552_s9 + $0x8] sm:$0xff]  }
 0x115   :  { %1298 = vmatpush1.bf16.msra.mxu0 %v2145_v44  ;;  %1380 = vmatpush1.bf16.msra.mxu1 %v2148_v45  ;;  %v2230_v44 = vld [vmem:[%s2552_s9 + $0x88] sm:$0xff]   ;;  %v2231_v45 = vld [vmem:[%s2552_s9 + $0x50] sm:$0xff]  }
 0x116   :  { %1299 = vmatprep.subr.bf16.mxu0 %v2153_v46  ;;  %1381 = vmatprep.subr.bf16.mxu1 %v2156_v47  ;;  %v2232_v46 = vld [vmem:[%s2552_s9 + $0xd0] sm:$0xff]  }
 0x117   :  { %v2233_v47 = vld [vmem:[%s2552_s9 + $0x10] sm:$0xff]  }
 0x119   :  { %1300 = vmatpush1.bf16.msra.mxu0 %v2151_v48  ;;  %1382 = vmatpush1.bf16.msra.mxu1 %v2154_v49  ;;  %v2234_v48 = vld [vmem:[%s2552_s9 + $0x90] sm:$0xff]   ;;  %v2235_v49 = vld [vmem:[%s2552_s9 + $0x58] sm:$0xff]  }
 0x11a   :  { %1301 = vmatprep.subr.bf16.mxu0 %v2159_v50  ;;  %1383 = vmatprep.subr.bf16.mxu1 %v2162_v51  ;;  %v2236_v50 = vld [vmem:[%s2552_s9 + $0xd8] sm:$0xff]  }
 0x11b   :  { %v2237_v51 = vld [vmem:[%s2552_s9 + $0x18] sm:$0xff]  }
 0x11d   :  { %1302 = vmatpush1.bf16.msra.mxu0 %v2157_v52  ;;  %1384 = vmatpush1.bf16.msra.mxu1 %v2160_v53  ;;  %v2238_v52 = vld [vmem:[%s2552_s9 + $0x98] sm:$0xff]   ;;  %v2239_v53 = vld [vmem:[%s2552_s9 + $0x60] sm:$0xff]  }
 0x11e   :  { %1303 = vmatprep.subr.bf16.mxu0 %v2165_v54  ;;  %1385 = vmatprep.subr.bf16.mxu1 %v2168_v55  ;;  %v2240_v54 = vld [vmem:[%s2552_s9 + $0xe0] sm:$0xff]  }
 0x11f   :  { %v2241_v55 = vld [vmem:[%s2552_s9 + $0x20] sm:$0xff]  }
 0x121   :  { %1304 = vmatpush1.bf16.msra.mxu0 %v2163_v56  ;;  %1386 = vmatpush1.bf16.msra.mxu1 %v2166_v57  ;;  %v2242_v56 = vld [vmem:[%s2552_s9 + $0xa0] sm:$0xff]   ;;  %v2243_v57 = vld [vmem:[%s2552_s9 + $0x68] sm:$0xff]  }
 0x122   :  { %1305 = vmatprep.subr.bf16.mxu0 %v2171_v59  ;;  %1387 = vmatprep.subr.bf16.mxu1 %v2174_v60  ;;  %v2244_v59 = vld [vmem:[%s2552_s9 + $0xe8] sm:$0xff]  }
 0x123   :  { %v2245_v60 = vld [vmem:[%s2552_s9 + $0x28] sm:$0xff]  }
 0x125   :  { %1306 = vmatpush1.bf16.msra.mxu0 %v2169_v62  ;;  %1388 = vmatpush1.bf16.msra.mxu1 %v2172_v63  ;;  %v2246_v62 = vld [vmem:[%s2552_s9 + $0xa8] sm:$0xff]   ;;  %v2247_v63 = vld [vmem:[%s2552_s9 + $0x70] sm:$0xff]  }
 0x126   :  { %1307 = vmatprep.subr.bf16.mxu0 %v2177_v0  ;;  %1389 = vmatprep.subr.bf16.mxu1 %v2180_v1  ;;  %v2248_v0 = vld [vmem:[%s2552_s9 + $0xf0] sm:$0xff]  }
 0x127   :  { %v2249_v1 = vld [vmem:[%s2552_s9 + $0x30] sm:$0xff]  }
 0x129   :  { %1308 = vmatpush1.bf16.msra.mxu0 %v2175_v2  ;;  %1390 = vmatpush1.bf16.msra.mxu1 %v2178_v4  ;;  %v2250_v2 = vld [vmem:[%s2552_s9 + $0xb0] sm:$0xff]   ;;  %v2251_v4 = vld [vmem:[%s2552_s9 + $0x78] sm:$0xff]  }
 0x12a   :  { %1309 = vmatprep.subr.bf16.mxu0 %v2183_v7  ;;  %1391 = vmatprep.subr.bf16.mxu1 %v2186_v8  ;;  %v2252_v7 = vld [vmem:[%s2552_s9 + $0xf8] sm:$0xff]  }
 0x12b   :  { %v2253_v8 = vld [vmem:[%s2552_s9 + $0x38] sm:$0xff]  }
 0x12d   :  { %1310 = vmatpush1.bf16.msra.mxu0 %v2181_v9  ;;  %1392 = vmatpush1.bf16.msra.mxu1 %v2184_v10  ;;  %v2254_v9 = vld [vmem:[%s2552_s9 + $0xb8] sm:$0xff]   ;;  %v588_v10 = vld [vmem:[%s2551_s8] sm:$0xf] }
 0x12e   :  { %1311 = vmatprep.subr.bf16.mxu0 %v2189_v11  ;;  %1393 = vmatprep.subr.bf16.mxu1 %v2192_v12  ;;  %v593_v11 = vrot.slane %v588_v10, %v430_v58  ;;  %v601_v12 = vrot.slane %v588_v10, %v438_v3 }
 0x131   :  { %1312 = vmatpush1.bf16.msra.mxu0 %v2187_v13  ;;  %1394 = vmatpush1.bf16.msra.mxu1 %v2190_v14  ;;  %v597_v13 = vrot.slane %v588_v10, %v434_v61  ;;  %v605_v14 = vrot.slane %v588_v10, %v442_v6 }
 0x132   :  { %1313 = vmatprep.subr.bf16.mxu0 %v2195_v15  ;;  %1395 = vmatprep.subr.bf16.mxu1 %v2198_v16 }
 0x135   :  { %1314 = vmatpush1.bf16.msra.mxu0 %v2193_v17  ;;  %1396 = vmatpush1.bf16.msra.mxu1 %v2196_v18 }
 0x136   :  { %1315 = vmatprep.subr.bf16.mxu0 %v2201_v19  ;;  %1397 = vmatprep.subr.bf16.mxu1 %v2204_v20 }
 0x139   :  { %1316 = vmatpush1.bf16.msra.mxu0 %v2199_v21  ;;  %1398 = vmatpush1.bf16.msra.mxu1 %v2202_v22 }
 0x13a   :  { %1317 = vmatprep.subr.bf16.mxu0 %v2207_v23  ;;  %1399 = vmatprep.subr.bf16.mxu1 %v2210_v24 }
 0x13d   :  { %1318 = vmatpush1.bf16.msra.mxu0 %v2205_v26  ;;  %1400 = vmatpush1.bf16.msra.mxu1 %v2208_v27 }
 0x13e   :  { %1319 = vmatprep.subr.bf16.mxu0 %v2213_v28  ;;  %1401 = vmatprep.subr.bf16.mxu1 %v2216_v29 }
 0x141   :  { %1320 = vmatpush1.bf16.msra.mxu0 %v2211_v30  ;;  %1402 = vmatpush1.bf16.msra.mxu1 %v2214_v31 }
 0x142   :  { %1321 = vmatprep.subr.bf16.mxu0 %v2219_v32  ;;  %1403 = vmatprep.subr.bf16.mxu1 %v2222_v33  ;;  %v1922_v33 = vld [vmem:[%s2553_s10] ss:$0 sm:$0xff] }
 0x145   :  { %1322 = vmatpush1.bf16.msra.mxu0 %v2217_v34  ;;  %1404 = vmatpush1.bf16.msra.mxu1 %v2220_v35 }
 0x146   :  { %1955 = vmatprep.subr.bf16.mxu0 %v2223_v37  ;;  %1977 = vmatprep.subr.bf16.mxu1 %v2224_v38 }
 0x148   :  { %1324 = vmatmul.mubr.bf16.vlgmr.msra.gmra.mrb[12].mxu0 %v458_v40  ;;  %1406 = vmatmul.mubr.bf16.vlgmr.msra.gmra.mrb[12].mxu1 %v458_v40 }
 0x149   :  { %1956 = vmatpush3.bf16.msra.mxu0 %v2225_v39  ;;  %1978 = vmatpush3.bf16.msra.mxu1 %v2226_v25 }
 0x14a   :  { %1957 = vmatprep.subr.bf16.mxu0 %v2227_v41  ;;  %1979 = vmatprep.subr.bf16.mxu1 %v2228_v42 }
 0x14d   :  { %1958 = vmatpush3.bf16.msra.mxu0 %v2229_v43  ;;  %1980 = vmatpush3.bf16.msra.mxu1 %v2230_v44 }
 0x14e   :  { %1959 = vmatprep.subr.bf16.mxu0 %v2231_v45  ;;  %1981 = vmatprep.subr.bf16.mxu1 %v2232_v46 }
 0x151   :  { %1960 = vmatpush3.bf16.msra.mxu0 %v2233_v47  ;;  %1982 = vmatpush3.bf16.msra.mxu1 %v2234_v48 }
 0x152   :  { %1961 = vmatprep.subr.bf16.mxu0 %v2235_v49  ;;  %1983 = vmatprep.subr.bf16.mxu1 %v2236_v50 }
 0x155   :  { %1962 = vmatpush3.bf16.msra.mxu0 %v2237_v51  ;;  %1984 = vmatpush3.bf16.msra.mxu1 %v2238_v52 }
 0x156   :  { %1963 = vmatprep.subr.bf16.mxu0 %v2239_v53  ;;  %1985 = vmatprep.subr.bf16.mxu1 %v2240_v54 }
 0x159   :  { %1964 = vmatpush3.bf16.msra.mxu0 %v2241_v55  ;;  %1986 = vmatpush3.bf16.msra.mxu1 %v2242_v56 }
 0x15a   :  { %1965 = vmatprep.subr.bf16.mxu0 %v2243_v57  ;;  %1987 = vmatprep.subr.bf16.mxu1 %v2244_v59 }
 0x15d   :  { %1966 = vmatpush3.bf16.msra.mxu0 %v2245_v60  ;;  %1988 = vmatpush3.bf16.msra.mxu1 %v2246_v62 }
 0x15e   :  { %1967 = vmatprep.subr.bf16.mxu0 %v2247_v63  ;;  %1989 = vmatprep.subr.bf16.mxu1 %v2248_v0 }
 0x161   :  { %1968 = vmatpush3.bf16.msra.mxu0 %v2249_v1  ;;  %1990 = vmatpush3.bf16.msra.mxu1 %v2250_v2 }
 0x162   :  { %1969 = vmatprep.subr.bf16.mxu0 %v2251_v4  ;;  %1991 = vmatprep.subr.bf16.mxu1 %v2252_v7 }
 0x165   :  { %1970 = vmatpush3.bf16.msra.mxu0 %v2253_v8  ;;  %1992 = vmatpush3.bf16.msra.mxu1 %v2254_v9 }
 0x21b   :  { %v1325_v15 = vpop.f32.mrb[12].mxu0  ;;  %v1407_v16 = vpop.f32.mrb[12].mxu1 }
 0x21c   :  { %v1999_v17 = vadd.f32 %v1325_v15, %v593_v11  ;;  %v2001_v18 = vadd.f32 %v1407_v16, %v601_v12  ;;  %v1327_v19 = vpop.f32.mrb[13].mxu0  ;;  %v1409_v20 = vpop.f32.mrb[13].mxu1 }
 0x21d   :  { %v2000_v21 = vadd.f32 %v1327_v19, %v597_v13  ;;  %v2002_v22 = vadd.f32 %v1409_v20, %v605_v14  ;;  %v1329_v23 = vpop.f32.mrb[14].mxu0  ;;  %v1411_v24 = vpop.f32.mrb[14].mxu1 }
 0x21e   :  { %v1414_v58 = vmax.f32 %v1999_v17, 0.0  ;;  %v1416_v26 = vmax.f32 %v2001_v18, 0.0  ;;  %v1330_v27 = vpop.f32.mrb[15].mxu0  ;;  %v1412_v3 = vpop.f32.mrb[15].mxu1 }
 0x21f   :  { %v1415_v28 = vmax.f32 %v2000_v21, 0.0  ;;  %v1417_v29 = vmax.f32 %v2002_v22, 0.0 }
 0x220   :  { %v1418_v5 = vpack.c.bf16 %v1414_v58, %v1414_v58  ;;  %v1420_v6 = vpack.c.bf16 %v1416_v26, %v1416_v26 }
 0x221   :  { %v1419_v61 = vpack.c.bf16 %v1415_v28, %v1415_v28  ;;  %v1421_v30 = vpack.c.bf16 %v1417_v29, %v1417_v29 }
 0x223   :  { %1717 = vmatprep.mubr.bf16.mxu0 %v1419_v61  ;;  %1757 = vmatprep.mubr.bf16.mxu1 %v1421_v30 }
 0x224   :  { %1718 = vmatmul.mubr.bf16.vlgmr.msra.gmra.mrb[16].mxu0 %v1418_v5  ;;  %1758 = vmatmul.mubr.bf16.vlgmr.msra.gmra.mrb[16].mxu1 %v1420_v6 }
 0x2f7   :  { %v1971_v31 = vpop.f32.mrb[16].mxu0  ;;  %v1993_v32 = vpop.f32.mrb[16].mxu1 }
 0x2f8   :  { %v1972_v34 = vpop.f32.mrb[17].mxu0  ;;  %v1994_v35 = vpop.f32.mrb[17].mxu1 }
 0x2f9   :  { %v1973_v36 = vadd.f32 %v1972_v34, %v1971_v31  ;;  %v1995_v37 = vadd.f32 %v1994_v35, %v1993_v32  ;;  %v1974_v38 = vpop.f32.mrb[18].mxu0  ;;  %v1996_v39 = vpop.f32.mrb[18].mxu1 }
 0x2fa   :  { %v1975_v25 = vpop.f32.mrb[19].mxu0  ;;  %v1997_v40 = vpop.f32.mrb[19].mxu1 }
 0x2fb   :  { %v1720_v41 = vadd.f32 %v1973_v36, %v1922_v33 }
 0x2fd   :  { %v1760_v42 = vadd.f32 %v1995_v37, %v1720_v41 }
 0x2ff   :  { %1766 = vst.msk [vmem:[%s2554_s11] sm:$0xff] %vm1765_vm6, %v1760_v42 }
 0x300   :  { %1771 = vsyncpa [#allocation3], 1 }

</bundles_post_ra>
